<compile_context>
chip_gen: v7x
topology: tpu7x:2x2x1
jax: 0.10.0
libtpu: 0.0.40
codegen_flags: <defaults>
</compile_context>

<pallas_src>
import functools

import jax
import jax.numpy as jnp
from jax.experimental import pallas as pl
from jax.experimental.pallas import tpu as pltpu


def _layernorm_kernel(x_ref, w_ref, b_ref, o_ref, *, eps, inv_c):
    # x_ref / o_ref: (1, C, TILE_HW); w_ref / b_ref: (C, 1)
    x = x_ref[...]
    xf = x.astype(jnp.float32)

    # Single-pass statistics over the channel (sublane) axis, f32 accumulation.
    s1 = jnp.sum(xf, axis=1, keepdims=True)          # (1, 1, T)
    s2 = jnp.sum(xf * xf, axis=1, keepdims=True)     # (1, 1, T)
    mean = s1 * inv_c
    var = jnp.maximum(s2 * inv_c - mean * mean, 0.0)  # clamp tiny negative drift
    inv_std = jax.lax.rsqrt(var + eps)

    # Elementwise tail in the compute dtype: bf16 inputs stay bf16 (native on
    # v6e/v7x VPU), f32 inputs stay f32.
    cdt = x.dtype if x.dtype == jnp.bfloat16 else jnp.float32
    y = (x.astype(cdt) - mean.astype(cdt)) * inv_std.astype(cdt)
    w = w_ref[...].astype(cdt)[None]                  # (1, C, 1)
    b = b_ref[...].astype(cdt)[None]
    o_ref[...] = (y * w + b).astype(o_ref.dtype)


def _device_params():
    """(vmem_capacity_bytes, per-block target bytes) — generation aware."""
    try:
        vmem_cap = int(pltpu.get_tpu_info().vmem_capacity_bytes)
    except Exception:
        vmem_cap = 64 * 2**20                          # conservative (v7x-sized)
    # v7x: 64 MiB VMEM / TC and ~1.6 TB/s per TC -> smaller 4 MiB tiles.
    # v5e/v6e: 128 MiB VMEM -> 6 MiB tiles to amortize per-step overhead.
    target_bytes = 4 * 2**20 if vmem_cap <= 64 * 2**20 else 6 * 2**20
    return vmem_cap, target_bytes


def _pick_tile_hw(hw, n_batch, c, itemsize, target_bytes, min_total_steps=4):
    """Lane tile along H*W: a multiple of 128, ~target_bytes per input block."""
    if hw < 128:
        return hw                                      # full extent: always legal
    max_mult = (hw // 128) * 128                       # largest 128-multiple <= hw
    by_bytes = (target_bytes // (c * itemsize)) // 128 * 128
    tile = max(128, min(max_mult, by_bytes))
    # Keep >= min_total_steps grid steps so both v7x TensorCores get work.
    while tile > 128 and n_batch * pl.cdiv(hw, tile) < min_total_steps:
        tile = max(128, ((tile // 2) // 128) * 128)
    return tile


def layer_norm_channels_first(x, weight, bias, eps=1e-6):
    """x: (N, C, H, W).  Normalizes over C.  Returns (N, C, H, W)."""
    N, C, H, W = x.shape
    HW = H * W
    x3 = x.reshape(N, C, HW)                           # free reshape, no transpose
    itemsize = jnp.dtype(x.dtype).itemsize

    vmem_cap, target_bytes = _device_params()
    tile = _pick_tile_hw(HW, N, C, itemsize, target_bytes)
    grid = (N, pl.cdiv(HW, tile))

    w2 = weight.reshape(C, 1)
    b2 = bias.reshape(C, 1)

    # Double-buffered in + out blocks plus ~4 f32 working tiles, plus slack,
    # clamped to 3/4 of the physical VMEM (64 MiB on v7x, 128 MiB on v5e/v6e).
    block_bytes = C * tile * itemsize
    f32_block_bytes = C * tile * 4
    need = 4 * block_bytes + 4 * f32_block_bytes + (2 << 20)
    vmem_limit = int(min(max(32 * 2**20, need), (vmem_cap * 3) // 4))

    out3 = pl.pallas_call(
        functools.partial(_layernorm_kernel, eps=eps, inv_c=1.0 / C),
        out_shape=jax.ShapeDtypeStruct((N, C, HW), x.dtype),
        grid_spec=pltpu.PrefetchScalarGridSpec(
            num_scalar_prefetch=0,
            grid=grid,
            in_specs=[
                pl.BlockSpec((1, C, tile), lambda n, j: (n, 0, j)),
                pl.BlockSpec((C, 1), lambda n, j: (0, 0)),
                pl.BlockSpec((C, 1), lambda n, j: (0, 0)),
            ],
            out_specs=pl.BlockSpec((1, C, tile), lambda n, j: (n, 0, j)),
        ),
        compiler_params=pltpu.CompilerParams(
            dimension_semantics=("parallel", "parallel"),
            vmem_limit_bytes=vmem_limit,
        ),
    )(x3, w2, b2)

    return out3.reshape(N, C, H, W)


def layer_norm_ref(x, weight, bias, eps=1e-6):
    # Pure-JAX reference (channels_first), for correctness check.
    xf = x.astype(jnp.float32)
    mean = jnp.mean(xf, axis=1, keepdims=True)
    var = jnp.mean((xf - mean) ** 2, axis=1, keepdims=True)
    y = (xf - mean) * jax.lax.rsqrt(var + eps)
    w = weight.reshape(1, -1, 1, 1).astype(jnp.float32)
    b = bias.reshape(1, -1, 1, 1).astype(jnp.float32)
    return (y * w + b).astype(x.dtype)


def _check(x, weight, bias, tol):
    out = jax.block_until_ready(layer_norm_channels_first(x, weight, bias, eps=1e-6))
    ref = layer_norm_ref(x, weight, bias, eps=1e-6)
    assert out.shape == x.shape
    err = jnp.max(jnp.abs(out.astype(jnp.float32) - ref.astype(jnp.float32)))
    assert err < tol, f"mismatch vs reference: {err}"


if __name__ == "__main__":
    key = jax.random.PRNGKey(0)

    # Primary test: module-consistent small shape, deterministic param init.
    N, C, H, W = 2, 4, 16, 16
    x = jax.random.normal(key, (N, C, H, W), dtype=jnp.float32)
    weight = jnp.ones((C,), dtype=jnp.float32)
    bias = jnp.zeros((C,), dtype=jnp.float32)
    _check(x, weight, bias, tol=1e-4)

    # Tail-path test: H*W not a multiple of 128 (exercises masked boundary block).
    k2 = jax.random.PRNGKey(1)
    C2 = 8
    x2 = jax.random.normal(k2, (1, C2, 18, 18), dtype=jnp.float32)
    w2 = jnp.ones((C2,), dtype=jnp.float32)
    b2 = jnp.zeros((C2,), dtype=jnp.float32)
    _check(x2, w2, b2, tol=1e-4)

    # bf16 tail test (loose tolerance for bf16 rounding in the elementwise tail).
    x3 = x2.astype(jnp.bfloat16)
    _check(x3, w2, b2, tol=0.1)

    print("KERNEL_OK")
</pallas_src>

<mosaic_0001>
module attributes {stable_mosaic.version = 11 : i64} {
  func.func @_layernorm_kernel(%arg0: i32, %arg1: i32, %arg2: memref<1x4x128xf32, #tpu.memory_space<vmem>>, %arg3: memref<4x1xf32, #tpu.memory_space<vmem>>, %arg4: memref<4x1xf32, #tpu.memory_space<vmem>>, %arg5: memref<1x4x128xf32, #tpu.memory_space<vmem>>) attributes {dimension_semantics = [#tpu.dimension_semantics<parallel>, #tpu.dimension_semantics<parallel>], iteration_bounds = array<i64: 2, 2>, scalar_prefetch = 0 : i64, scratch_operands = 0 : i64, tpu.core_type = #tpu.core_type<tc>, window_params = [{transform_indices = @transform_0, window_bounds = array<i64: 1, 4, 128>}, {pipeline_mode = #tpu.pipeline_mode<synchronous>, transform_indices = @transform_1, window_bounds = array<i64: 4, 1>}, {pipeline_mode = #tpu.pipeline_mode<synchronous>, transform_indices = @transform_2, window_bounds = array<i64: 4, 1>}, {transform_indices = @transform_3, window_bounds = array<i64: 1, 4, 128>}]} {
    %c0 = arith.constant 0 : index
    %c0_0 = arith.constant 0 : index
    %c0_1 = arith.constant 0 : index
    %0 = vector.load %arg2[%c0, %c0_0, %c0_1] : memref<1x4x128xf32, #tpu.memory_space<vmem>>, vector<1x4x128xf32>
    %cst = arith.constant dense<0.000000e+00> : vector<1x128xf32>
    %1 = vector.multi_reduction <add>, %0, %cst [1] : vector<1x4x128xf32> to vector<1x128xf32>
    %2 = vector.shape_cast %1 : vector<1x128xf32> to vector<1x1x128xf32>
    %3 = arith.mulf %0, %0 : vector<1x4x128xf32>
    %cst_2 = arith.constant dense<0.000000e+00> : vector<1x128xf32>
    %4 = vector.multi_reduction <add>, %3, %cst_2 [1] : vector<1x4x128xf32> to vector<1x128xf32>
    %5 = vector.shape_cast %4 : vector<1x128xf32> to vector<1x1x128xf32>
    %cst_3 = arith.constant 2.500000e-01 : f32
    %6 = vector.broadcast %cst_3 : f32 to vector<1x1x128xf32>
    %7 = arith.mulf %2, %6 : vector<1x1x128xf32>
    %cst_4 = arith.constant 2.500000e-01 : f32
    %8 = vector.broadcast %cst_4 : f32 to vector<1x1x128xf32>
    %9 = arith.mulf %5, %8 : vector<1x1x128xf32>
    %10 = arith.mulf %7, %7 : vector<1x1x128xf32>
    %11 = arith.subf %9, %10 : vector<1x1x128xf32>
    %cst_5 = arith.constant 0.000000e+00 : f32
    %12 = vector.broadcast %cst_5 : f32 to vector<1x1x128xf32>
    %13 = arith.maximumf %11, %12 : vector<1x1x128xf32>
    %cst_6 = arith.constant 9.99999997E-7 : f32
    %14 = vector.broadcast %cst_6 : f32 to vector<1x1x128xf32>
    %15 = arith.addf %13, %14 : vector<1x1x128xf32>
    %16 = math.rsqrt %15 : vector<1x1x128xf32>
    %17 = vector.broadcast %7 : vector<1x1x128xf32> to vector<1x4x128xf32>
    %18 = arith.subf %0, %17 : vector<1x4x128xf32>
    %19 = vector.broadcast %16 : vector<1x1x128xf32> to vector<1x4x128xf32>
    %20 = arith.mulf %18, %19 : vector<1x4x128xf32>
    %c0_7 = arith.constant 0 : index
    %c0_8 = arith.constant 0 : index
    %21 = vector.load %arg3[%c0_7, %c0_8] : memref<4x1xf32, #tpu.memory_space<vmem>>, vector<4x1xf32>
    %22 = vector.shape_cast %21 : vector<4x1xf32> to vector<1x4x1xf32>
    %c0_9 = arith.constant 0 : index
    %c0_10 = arith.constant 0 : index
    %23 = vector.load %arg4[%c0_9, %c0_10] : memref<4x1xf32, #tpu.memory_space<vmem>>, vector<4x1xf32>
    %24 = vector.shape_cast %23 : vector<4x1xf32> to vector<1x4x1xf32>
    %25 = vector.broadcast %22 : vector<1x4x1xf32> to vector<1x4x128xf32>
    %26 = arith.mulf %20, %25 : vector<1x4x128xf32>
    %27 = vector.broadcast %24 : vector<1x4x1xf32> to vector<1x4x128xf32>
    %28 = arith.addf %26, %27 : vector<1x4x128xf32>
    %c0_11 = arith.constant 0 : index
    %c0_12 = arith.constant 0 : index
    %c0_13 = arith.constant 0 : index
    %29 = vector.load %arg5[%c0_11, %c0_12, %c0_13] : memref<1x4x128xf32, #tpu.memory_space<vmem>>, vector<1x4x128xf32>
    tpu.vector_store %arg5[%c0_11, %c0_12, %c0_13], %28 {strides = array<i32>} : memref<1x4x128xf32, #tpu.memory_space<vmem>>, vector<1x4x128xf32>,
    return
  }
  func.func @transform_0(%arg0: i32, %arg1: i32) -> (i32, i32, i32) {
    %c0_i32 = arith.constant 0 : i32
    %c0_i32_0 = arith.constant 0 : i32
    return %arg0, %c0_i32, %arg1 : i32, i32, i32
  }
  func.func @transform_1(%arg0: i32, %arg1: i32) -> (i32, i32) {
    %c0_i32 = arith.constant 0 : i32
    %c0_i32_0 = arith.constant 0 : i32
    %c0_i32_1 = arith.constant 0 : i32
    return %c0_i32, %c0_i32_0 : i32, i32
  }
  func.func @transform_2(%arg0: i32, %arg1: i32) -> (i32, i32) {
    %c0_i32 = arith.constant 0 : i32
    %c0_i32_0 = arith.constant 0 : i32
    %c0_i32_1 = arith.constant 0 : i32
    return %c0_i32, %c0_i32_0 : i32, i32
  }
  func.func @transform_3(%arg0: i32, %arg1: i32) -> (i32, i32, i32) {
    %c0_i32 = arith.constant 0 : i32
    %c0_i32_0 = arith.constant 0 : i32
    return %arg0, %c0_i32, %arg1 : i32, i32, i32
  }
}

</mosaic_0001>

<bundles_post_ra>
// kernel: tpu_custom_call.1
= control target key start
LH: loop header
LB: loop body
LE: loop exit
PB: predicated region body
PF: predicated region fallthrough
CT: control target
= control target key end

     0   :  { %8 = vsyncpa [#allocation3], 0  ;;  %s800_s0 = inlined_call_operand.hbm [shape: f32[2,4,256], index: 0, kind: input, shape index: {}]   ;;  %s801_s1 = inlined_call_operand.vmem [shape: f32[4,1], index: 1, kind: input, shape index: {}]   ;;  %s802_s2 = inlined_call_operand.vmem [shape: f32[4,1], index: 2, kind: input, shape index: {}]   ;;  %s803_s3 = inlined_call_operand.hbm [shape: f32[2,4,256], index: 3, kind: output, shape index: {}]  }
   0x1   :  { %10 = vsyncpa [#allocation3 + $0x1], 0 }
   0x2   :  { %11 = vsyncpa [#allocation4], 0 }
   0x3   :  { %13 = vsyncpa [#allocation4 + $0x1], 0  ;;  %s596_s12 = smov 0   ;;  %s598_s13 = smov 0  }
   0x4   :  { %s600_s14 = smov 0   ;;  %s602_s15 = smov 0  }
   0x5   :  { %s604_s16 = smov 0   ;;  %s606_s17 = smov 0  }
   0x6   :  { %s608_s18 = smov 0   ;;  %s610_s19 = smov 0  }
   0x7 LB: > { %s346_s20 = sadd.s32 4294967295, %s571_s19   ;;  %s347_s21 = sadd.s32 4294967294, %s571_s19   ;;  %s571_s19 = sphi %s610_s19, %s19_s19   ;;  %s567_s18 = sphi %s608_s18, %s820_s18   ;;  %s563_s17 = sphi %s606_s17, %s819_s17   ;;  %s559_s16 = sphi %s604_s16, %s818_s16   ;;  %s555_s15 = sphi %s602_s15, %s817_s15   ;;  %s551_s14 = sphi %s600_s14, %s816_s14   ;;  %s547_s13 = sphi %s598_s13, %s815_s13   ;;  %s543_s12 = sphi %s596_s12, %s814_s12  }
   0x8   : > { %s28_s22 = sadd.s32 1, %s563_s17  ;;  %s31_s23 = sadd.s32 1, %s567_s18 }
   0x9   : > { %p29_p0 = scmp.ge.s32.totalorder %s28_s22, 2  ;;  %s40_s24 = sadd.s32 1, %s551_s14 }
   0xa   : > { %p47_p1 = scmp.ne.s32.totalorder %s551_s14, %s547_s13  ;;  %p48_p2 = scmp.eq.s32.totalorder %s571_s19, 0 }
   0xb   : > { %s822_s22 = smov (%p29_p0, %s28_s22), 0  ;;  %s824_s23 = smov (!%p29_p0, %s31_s23), %s567_s18 }
   0xc   : > { %s36_s25 = ssub.s32 %s563_s17, %s822_s22  ;;  %p649_p3 = por %p48_p2, %p47_p1 }
   0xd   : > { %p33_p4 = scmp.ge.s32.totalorder %s824_s23, 2  ;;  %p53_p5 = scmp.ne.s32.totalorder %s547_s13, %s543_s12 }
   0xe   : > { %p54_p6 = scmp.eq.s32.totalorder %s346_s20, 0  ;;  %p121_p7 = scmp.eq.s32.totalorder %s346_s20, 3 }
   0xf   : > { %s826_s23 = smov (%p33_p4, %s824_s23), 0  ;;  %p127_p10 = scmp.eq.s32.totalorder %s347_s21, 3 }
  0x10   : > { %p657_p8 = por %p54_p6, %p53_p5  ;;  %p661_p9 = por %p121_p7, %p47_p1 }
  0x11   : > { %s35_s29 = ssub.s32 %s567_s18, %s826_s23  ;;  %p667_p12 = por %p127_p10, %p53_p5 }
  0x12   : > { %s807_s28 = scalar_select %p661_p9, 1, 0 }
  0x13   : > { %s37_s30 = sor.u32 %s36_s25, %s35_s29  ;;  %p373_p13 = scmp.lt.s32.totalorder %s571_s19, 4 }
  0x14   : > { %p38_p11 = scmp.eq.s32.totalorder %s37_s30, 0  ;;  %s153_s5 = sand.u32 1, %s551_s14  }
  0x15   : > { %s808_s4 = scalar_select %p667_p12, 1, 0 }
  0x16   : > { %s674_s6 = scalar_select %p38_p11, %s551_s14, %s40_s24  }
  0x17   : > { %s350_s7 = sshll.u32 %s153_s5, 2  ;;  %s351_s8 = sshll.u32 %s567_s18, 1 }
  0x18   : > { %s162_s9 = sadd.s32 %s563_s17, %s351_s8  ;;  %s157_s10 = scalar_lea.vmem [#allocation2], %s350_s7 }
  0x19   : > { %s166_s11 = sshll.u32 %s157_s10, 4  ;;  %s352_s20 = sshll.u32 %s162_s9, 6  ;;  %s678_s11 = int_to_ptr.vmem [resolvable:$true] %s166_s11 }
  0x1a   : > { %s683_s29 = scalar_lea.hbm %s800_s0, %s352_s20  ;;  %p687_p0 = pnand %p373_p13, %p649_p3 }
  0x1b   : > { %s154_s30 = scalar_lea.sflag [#allocation3], %s153_s5  ;;  %s443_s7 = scalar_lea.hbm %s683_s29, 64 }
  0x1c   : > { %p444_p4 = scmp.ne.s32.totalorder %s683_s29, %s443_s7  ;;  %p445_p5 = pneg %p687_p0 }
  0x1d   : > { %s448_s9 = scalar_lea.hbm %s800_s0, 256  ;;  %p449_p3 = scmp.lt.u32.totalorder %s683_s29, %s800_s0 }
  0x1e   : > { %p446_p6 = pnand %p445_p5, %p444_p4  ;;  %p450_p10 = scmp.lt.u32.totalorder %s448_s9, %s443_s7 }
  0x1f   : > { %p452_p13 = scmp.lt.u32.totalorder %s443_s7, %s683_s29 }
  0x20   : > { %p447_p7 = pneg %p446_p6  ;;  %p451_p11 = por %p450_p10, %p449_p3 }
  0x22   : > { %p453_p1 = por %p452_p13, %p451_p11 }
  0x24   : > { %p454_p2 = pnand %p453_p1, %p447_p7 }
  0x26   : > { %457 = shalt.err (!%p454_p2)
}
  0x27   : > { %s458_s5 = scalar_lea.vmem %s678_s11, 64  ;;  %s573_s21 = smov [#allocation2]  }
  0x28   : > { %p459_p4 = scmp.ne.s32.totalorder %s678_s11, %s458_s5  ;;  %s463_s25 = sshll.u32 %s573_s21, 4  ;;  %s464_s25 = int_to_ptr.vmem [resolvable:$false] %s463_s25 }
  0x29   : > { %s465_s26 = scalar_lea.vmem %s464_s25, 128  ;;  %p466_p9 = scmp.lt.s32.totalorder %s678_s11, %s464_s25 }
  0x2a   : > { %p461_p6 = pnand %p459_p4, %p445_p5  ;;  %p467_p3 = scmp.lt.s32.totalorder %s465_s26, %s458_s5 }
  0x2c   : > { %p462_p12 = pneg %p461_p6  ;;  %p468_p10 = por %p467_p3, %p466_p9 }
  0x2e   : > { %p469_p11 = pnand %p468_p10, %p462_p12 }
  0x30   : > { %472 = shalt.err (!%p469_p11)
}
  0x31   : > { %368 = dma.hbm_to_vmem [thread:$0]  (!%p687_p0), %s683_s29, 64, %s678_s11, %s154_s30  }
  0x32   : > { %p810_p1 = scmp.lt.s32.totalorder %s571_s19, 5  ;;  %p811_p2 = scmp.ge.s32.totalorder %s571_s19, 1 }
  0x34   : > { %p172_p5 = pnand %p811_p2, %p810_p1 }
  0x35   : > { %s723_s7 = sand.u32 (!%p172_p5), 1, %s547_s13  }
  0x36   : > { %175 = sbr.rel (%p172_p5) target bundleno = 212 (0xd4), region = 32  ;;  %s354_s8 = sshll.u32 (!%p172_p5), %s723_s7, 2 }
  0x37   : > { %s178_s9 = scalar_lea.sflag (!%p172_p5), [#allocation3], %s723_s7  ;;  %s181_s24 = scalar_lea.vmem (!%p172_p5), [#allocation2], %s354_s8 }
  0x3d   : > { %534 = dma.done.wait (%p657_p8), %s178_s9, 64  }
  0x3e   : > { %536 = vsyncadd (%p657_p8), %s178_s9, 4294967232  ;;  %v574_v0 = vmov 0   ;;  %v230_v1 = vld [vmem:[%s801_s1] sm:$0xf]  ;;  %vm205_vm0 = vcmask 1043456   ;;  %s357_s27 = sshll.u32 %s559_s16, 1 }
  0x3f   : > { %440 = vset.pattern.permute.xlu0 %v574_v0  ;;  %v231_v2 = vld [vmem:[%s802_s2] sm:$0xf]  ;;  %s257_s20 = sadd.s32 %s555_s15, %s357_s27  ;;  %s203_s21 = scalar_lea.vmem [#allocation5], %s354_s8 }
  0x40   : > { %234 = vperm.xlu0 %440, %v230_v1   ;;  %v204_v3 = vld [vmem:[%s181_s24] sm:$0xf]  ;;  %s358_s5 = sshll.u32 %s257_s20, 6  ;;  %s261_s25 = sshll.u32 %s203_s21, 4  ;;  %s748_s25 = int_to_ptr.vmem [resolvable:$true] %s261_s25 }
  0x41   : > { %v206_v4 = vsel %vm205_vm0, %v204_v3, 0.0  ;;  %v213_v5 = vmul.f32 %v204_v3, %v204_v3  ;;  %s746_s24 = scalar_lea.hbm %s803_s3, %s358_s5  ;;  %s246_s15 = scalar_lea.sflag [#allocation4], %s723_s7 }
  0x42   : > { %v207_v6 = vrot.slane %v206_v4, 4  ;;  %s473_s16 = scalar_lea.vmem %s748_s25, 64  ;;  %p812_p9 = scmp.ne.s32.totalorder %s807_s28, 0 }
  0x43   : > { %v214_v7 = vsel %vm205_vm0, %v213_v5, 0.0  ;;  %p474_p8 = scmp.ne.s32.totalorder %s748_s25, %s473_s16  ;;  %s575_s8 = smov [#allocation5]  }
  0x44   : > { %240 = vperm.xlu0 %440, %v231_v2   ;;  %v208_v8 = vadd.f32 %v207_v6, %v206_v4  ;;  %v215_v9 = vrot.slane %v214_v7, 4  ;;  %s477_s11 = sshll.u32 %s575_s8, 4  ;;  %s478_s11 = int_to_ptr.vmem [resolvable:$false] %s477_s11 }
  0x45   : > { %p475_p12 = pnand %p474_p8, %p812_p9  ;;  %s479_s29 = scalar_lea.vmem %s478_s11, 128 }
  0x46   : > { %v209_v10 = vrot.slane %v208_v8, 2  ;;  %v216_v11 = vadd.f32 %v215_v9, %v214_v7  ;;  %p480_p7 = scmp.lt.s32.totalorder %s748_s25, %s478_s11  ;;  %p481_p13 = scmp.lt.s32.totalorder %s479_s29, %s473_s16 }
  0x47   : > { %p476_p0 = pneg %p475_p12 }
  0x48   : > { %v210_v12 = vadd.f32 %v209_v10, %v208_v8  ;;  %v217_v13 = vrot.slane %v216_v11, 2  ;;  %p482_p4 = por %p481_p13, %p480_p7 }
  0x4a   : > { %v211_v14 = vrot.slane %v210_v12, 1  ;;  %v218_v15 = vadd.f32 %v217_v13, %v216_v11  ;;  %p483_p6 = pnand %p482_p4, %p476_p0 }
  0x4c   : > { %v212_v16 = vadd.f32 %v211_v14, %v210_v12  ;;  %v219_v17 = vrot.slane %v218_v15, 1 }
  0x4e   : > { %v220_v18 = vadd.f32 %v219_v17, %v218_v15  ;;  %v221_v19 = vmul.f32 0.25, %v212_v16 }
  0x50   : > { %v222_v20 = vmul.f32 0.25, %v220_v18  ;;  %v223_v21 = vmul.f32 %v221_v19, %v221_v19  ;;  %v228_v25 = vsub.f32 %v204_v3, %v221_v19 }
  0x52   : > { %v224_v22 = vsub.f32 %v222_v20, %v223_v21 }
  0x54   : > { %v225_v23 = vmax.f32 %v224_v22, 0.0 }
  0x56   : > { %v226_v24 = vadd.f32 1e-06, %v225_v23 }
  0x58   : > { %441 = vrsqrt.f32 %v226_v24 }
  0x62   : > { %v442_v26 = vpop.eup %441 }
  0x63   : > { %v229_v27 = vmul.f32 %v442_v26, %v228_v25 }
  0xbf   : > { %v235_v28 = vpop.permute.xlu0 %234 }
  0xc0   : > { %v237_v29 = vmul.f32 %v235_v28, %v229_v27 }
  0xc3   : > { %v241_v30 = vpop.permute.xlu0 %240 }
  0xc4   : > { %v243_v31 = vadd.f32 %v241_v30, %v237_v29 }
  0xc6   : > { %244 = vst [vmem:[%s203_s21] sm:$0xf] %v243_v31 }
  0xc7   : > { %486 = shalt.err (!%p483_p6)
}
  0xc8   : > { %s487_s7 = scalar_lea.hbm %s746_s24, 64  ;;  %s491_s27 = scalar_lea.hbm %s803_s3, 256 }
  0xc9   : > { %p488_p3 = scmp.ne.s32.totalorder %s746_s24, %s487_s7  ;;  %p492_p1 = scmp.lt.u32.totalorder %s746_s24, %s803_s3 }
  0xca   : > { %p493_p2 = scmp.lt.u32.totalorder %s491_s27, %s487_s7  ;;  %p495_p8 = scmp.lt.u32.totalorder %s487_s7, %s746_s24 }
  0xcb   : > { %p489_p10 = pnand %p488_p3, %p812_p9 }
  0xcc   : > { %p494_p5 = por %p493_p2, %p492_p1 }
  0xcd   : > { %p490_p11 = pneg %p489_p10 }
  0xce   : > { %p496_p12 = por %p495_p8, %p494_p5 }
  0xd0   : > { %p497_p0 = pnand %p496_p12, %p490_p11 }
  0xd2   : > { %500 = shalt.err (!%p497_p0)
}
  0xd3   : > { %363 = dma.vmem_to_hbm [thread:$0]  (%p812_p9), %s748_s25, 64, %s746_s24, %s246_s15  }
  0xd4 PF: > { %p374_p7 = scmp.ge.s32.totalorder %s571_s19, 2  ;;  %s273_s21 = sand.u32 1, %s543_s12  }
  0xd5   : > { %p813_p13 = scmp.ne.s32.totalorder %s808_s4, 0  ;;  %s274_s26 = scalar_lea.sflag [#allocation4], %s273_s21 }
  0xd7   : > { %p370_p4 = pnand %p374_p7, %p813_p13 }
  0xd9   : > { %538 = dma.done.wait (!%p370_p4), %s274_s26, 64  }
  0xda   : > { %540 = vsyncadd (!%p370_p4), %s274_s26, 4294967232  ;;  %s19_s19 = sadd.s32 1, %s571_s19   ;;  %s814_s12 = smov %s547_s13 }
  0xdb   : > { %p16_p6 = scmp.ge.s32.totalorder %s19_s19, 6   ;;  %s815_s13 = smov %s551_s14 }
  0xdc   : > { %s816_s14 = smov %s674_s6  ;;  %s817_s15 = smov %s563_s17 }
  0xdd   : > { %s818_s16 = smov %s567_s18  ;;  %s819_s17 = smov %s822_s22 }
  0xde   : > { %s820_s18 = smov %s826_s23  ;;  %18 = sbr.rel (!%p16_p6) target bundleno = 7 (0x7), region = 77 }
  0xe5   :  { %279 = vsyncpa [#allocation3], 1 }
  0xe6   :  { %281 = vsyncpa [#allocation3 + $0x1], 1 }
  0xe7   :  { %282 = vsyncpa [#allocation4], 1 }
  0xe8   :  { %284 = vsyncpa [#allocation4 + $0x1], 1 }

</bundles_post_ra>
